<compile_context>
chip_gen: v7x
topology: tpu7x:2x2x1
jax: 0.10.0
libtpu: 0.0.40
codegen_flags: <defaults>
</compile_context>

<pallas_src>
import jax
import jax.numpy as jnp
from jax.experimental import pallas as pl
from jax.experimental.pallas import tpu as pltpu


def _transition_kernel(x_ref, scale_ref, shift_ref, p_ref, w_ref, o_ref):
    # x_ref:     (C, L)     NCHW slab of one image: L = 2*T*Wc contiguous spatial elements
    #                       (= 2*T full input rows = T output rows), read straight from HBM.
    # scale_ref: (C, 1)     folded BN scale  = 0.25 * gamma / sqrt(var + eps)
    # shift_ref: (C, 1)     folded BN shift  = 0.25 * (beta - mean * gamma / sqrt(var + eps))
    # p_ref:     (L, Lo)    0/1 pooling matrix, Lo = T*Wo, matmul dtype
    # w_ref:     (Cout, C)  1x1-conv weight, matmul dtype
    # o_ref:     (Cout, Lo) f32, written straight into the NCHW-flat output.
    #
    # BN (eval) + ReLU in f32 on the VPU; the 0.25 pool factor is already in scale/shift.
    y = jnp.maximum(x_ref[...] * scale_ref[...] + shift_ref[...], 0.0)
    # 2x2 average pool as a 0/1 matmul (MXU is otherwise idle in this mem-bound kernel).
    pooled = jnp.dot(y.astype(p_ref.dtype), p_ref[...],
                     preferred_element_type=jnp.float32)          # (C, Lo)
    # 1x1 conv: channels are the contraction dim => output is channel-major (NCHW-direct).
    out = jnp.dot(w_ref[...], pooled.astype(w_ref.dtype),
                  preferred_element_type=jnp.float32)             # (Cout, Lo)
    o_ref[...] = out.astype(o_ref.dtype)


def _vmem_params():
    """Generation-aware VMEM numbers: leave headroom below physical capacity
    (v7x = 64 MiB, v5e/v6e = 128 MiB) instead of hard-coding either."""
    phys = None
    try:
        phys = pltpu.get_tpu_info().vmem_capacity_bytes
    except Exception:
        phys = None
    if not phys:
        phys = 64 * 1024 * 1024           # conservative (v7x-sized) if the query is unavailable
    budget = int(phys * 0.55)             # what _pick_rows plans against
    limit = int(phys * 0.80)              # scoped VMEM limit handed to the compiler
    return budget, limit


def _pick_rows(ho, wo, c, cout, x_bytes, p_bytes, vmem_budget):
    """Pick T = output rows per grid step.  Constraints:
      * T divides Ho (exact tiling: no padding, no full-extent fallback),
      * lane extents L = 2*T*2*Wo and Lo = T*Wo are multiples of 128 or full-extent
        (TPU lane-layout rule),
      * double-buffered working set fits the VMEM budget.
    Prefer the largest valid T (fewest grid steps -> per-step overhead amortized)."""
    wc = 2 * wo
    s, so = 2 * ho * wc, ho * wo

    def valid(t):
        l, lo = 2 * t * wc, t * wo
        shape_ok = (l % 128 == 0 or l == s) and (lo % 128 == 0 or lo == so)
        vmem = (2 * c * l * x_bytes          # double-buffered input slab
                + 2 * cout * lo * 4          # double-buffered output slab (f32)
                + 2 * l * lo * p_bytes       # pooling matrix
                + 2 * cout * c * p_bytes     # conv weight
                + 4 * c * 4)                 # scale + shift
        return shape_ok and vmem <= vmem_budget

    for t in sorted((d for d in range(1, ho + 1) if ho % d == 0), reverse=True):
        if valid(t):
            return t
    return ho


def transition_forward(x_nchw, gamma, beta, running_mean, running_var, conv_w,
                       *, eps=1e-5, use_bf16_matmul=True):
    """Forward pass of `Transition` (inference / eval-mode BatchNorm).

    x_nchw: (N, Cin, H, W) float32.  conv_w: (Cout, Cin) or (Cout, Cin, 1, 1).
    Returns (N, Cout, H//2, W//2) float32 in NCHW (matching the PyTorch module).
    """
    f32 = jnp.float32
    N, C, H, W = x_nchw.shape
    Cout = conv_w.shape[0]
    Ho, Wo = H // 2, W // 2
    Hc, Wc = 2 * Ho, 2 * Wo            # AvgPool2d(2,2) floor-crops odd trailing rows/cols
    S, So = Hc * Wc, Ho * Wo

    # ---- fold BN (eval) and the 0.25 avg-pool factor into per-channel scale/shift ----
    inv_std = 1.0 / jnp.sqrt(running_var.astype(f32) + eps)
    bn_scale = gamma.astype(f32) * inv_std
    scale = (0.25 * bn_scale).reshape(C, 1)
    shift = (0.25 * (beta.astype(f32) - running_mean.astype(f32) * bn_scale)).reshape(C, 1)

    md = jnp.bfloat16 if use_bf16_matmul else f32
    w2 = conv_w.reshape(Cout, -1).astype(md)                        # (Cout, Cin)

    vmem_budget, vmem_limit = _vmem_params()
    T = _pick_rows(Ho, Wo, C, Cout,
                   x_bytes=x_nchw.dtype.itemsize,
                   p_bytes=jnp.dtype(md).itemsize,
                   vmem_budget=vmem_budget)
    L, Lo = 2 * T * Wc, T * Wo

    # ---- 0/1 pooling matrix for one (2*T input rows x Wc cols) -> (T x Wo) block ----
    l = jnp.arange(L)
    dst = (l // Wc // 2) * Wo + (l % Wc) // 2       # pooled index of each input element
    pool_mat = (dst[:, None] == jnp.arange(Lo)[None, :]).astype(md)

    # ---- metadata-only views: kernel reads NCHW and writes NCHW directly ----
    x_v = x_nchw[:, :, :Hc, :Wc].reshape(N, C, S)   # crop is a no-op for even H, W

    grid = (N, S // L)
    out_flat = pl.pallas_call(
        _transition_kernel,
        out_shape=jax.ShapeDtypeStruct((N, Cout, So), f32),
        grid=grid,
        in_specs=[
            # TODO(synk): pipeline_mode=pl.Buffered(3) here if DMA is still exposed on v7x.
            pl.BlockSpec((None, C, L), lambda n, i: (n, 0, i)),
            pl.BlockSpec((C, 1), lambda n, i: (0, 0)),
            pl.BlockSpec((C, 1), lambda n, i: (0, 0)),
            pl.BlockSpec((L, Lo), lambda n, i: (0, 0)),
            pl.BlockSpec((Cout, C), lambda n, i: (0, 0)),
        ],
        out_specs=pl.BlockSpec((None, Cout, Lo), lambda n, i: (n, 0, i)),
        compiler_params=pltpu.CompilerParams(
            dimension_semantics=("parallel", "parallel"),   # independent blocks -> megacore
            vmem_limit_bytes=vmem_limit,
        ),
    )(x_v, scale, shift, pool_mat, w2)

    # Metadata-only reshape; output is already NCHW.
    return out_flat.reshape(N, Cout, Ho, Wo)


def _reference_forward(x_nchw, gamma, beta, running_mean, running_var, conv_w, eps=1e-5):
    N, C, H, W = x_nchw.shape
    Cout = conv_w.shape[0]
    scale = gamma / jnp.sqrt(running_var + eps)
    xn = (x_nchw - running_mean[None, :, None, None]) * scale[None, :, None, None] \
         + beta[None, :, None, None]
    y = jnp.maximum(xn, 0.0)
    z = jnp.einsum("nchw,oc->nohw", y, conv_w.reshape(Cout, C))       # 1x1 conv, no bias
    z = z.reshape(N, Cout, H // 2, 2, W // 2, 2).mean(axis=(3, 5))    # AvgPool2d(2, 2)
    return z


if __name__ == "__main__":
    # Small shapes consistent with the module: batch=2, in_channels=4, out_channels=8, spatial=16
    N, Cin, Cout, H, W = 2, 4, 8, 16, 16

    key = jax.random.PRNGKey(0)
    kx, kg, kb, km, kv, kw = jax.random.split(key, 6)

    x = jax.random.normal(kx, (N, Cin, H, W), dtype=jnp.float32)
    gamma = 1.0 + 0.1 * jax.random.normal(kg, (Cin,), dtype=jnp.float32)
    beta = 0.1 * jax.random.normal(kb, (Cin,), dtype=jnp.float32)
    running_mean = 0.1 * jax.random.normal(km, (Cin,), dtype=jnp.float32)
    running_var = 1.0 + 0.1 * jax.random.uniform(kv, (Cin,), dtype=jnp.float32)
    conv_w = jax.random.normal(kw, (Cout, Cin), dtype=jnp.float32) * (2.0 / Cin) ** 0.5

    ref = _reference_forward(x, gamma, beta, running_mean, running_var, conv_w)

    # Exact-precision path (f32 matmuls): tight tolerance.
    out_f32 = transition_forward(x, gamma, beta, running_mean, running_var, conv_w,
                                 use_bf16_matmul=False)
    out_f32 = jax.block_until_ready(out_f32)
    assert out_f32.shape == (N, Cout, H // 2, W // 2)
    assert jnp.allclose(out_f32, ref, atol=1e-4, rtol=1e-4), "f32 path mismatch vs reference"

    # Default fast path (bf16 MXU operands, f32 accumulation): bf16-appropriate tolerance.
    out_bf16 = transition_forward(x, gamma, beta, running_mean, running_var, conv_w)
    out_bf16 = jax.block_until_ready(out_bf16)
    assert out_bf16.shape == (N, Cout, H // 2, W // 2)
    assert jnp.allclose(out_bf16, ref, atol=5e-2, rtol=5e-2), "bf16 path mismatch vs reference"

    print("KERNEL_OK")
</pallas_src>

<mosaic_0001>
module attributes {stable_mosaic.version = 11 : i64} {
  func.func @_transition_kernel(%arg0: i32, %arg1: i32, %arg2: memref<1x4x256xf32, #tpu.memory_space<vmem>>, %arg3: memref<4x1xf32, #tpu.memory_space<vmem>>, %arg4: memref<4x1xf32, #tpu.memory_space<vmem>>, %arg5: memref<256x64xf32, #tpu.memory_space<vmem>>, %arg6: memref<8x4xf32, #tpu.memory_space<vmem>>, %arg7: memref<1x8x64xf32, #tpu.memory_space<vmem>>) attributes {dimension_semantics = [#tpu.dimension_semantics<parallel>, #tpu.dimension_semantics<parallel>], iteration_bounds = array<i64: 2, 1>, scalar_prefetch = 0 : i64, scratch_operands = 0 : i64, tpu.core_type = #tpu.core_type<tc>, window_params = [{transform_indices = @transform_0, window_bounds = array<i64: 1, 4, 256>}, {pipeline_mode = #tpu.pipeline_mode<synchronous>, transform_indices = @transform_1, window_bounds = array<i64: 4, 1>}, {pipeline_mode = #tpu.pipeline_mode<synchronous>, transform_indices = @transform_2, window_bounds = array<i64: 4, 1>}, {pipeline_mode = #tpu.pipeline_mode<synchronous>, transform_indices = @transform_3, window_bounds = array<i64: 256, 64>}, {pipeline_mode = #tpu.pipeline_mode<synchronous>, transform_indices = @transform_4, window_bounds = array<i64: 8, 4>}, {transform_indices = @transform_5, window_bounds = array<i64: 1, 8, 64>}]} {
    %c0 = arith.constant 0 : index
    %c0_0 = arith.constant 0 : index
    %c0_1 = arith.constant 0 : index
    %0 = vector.load %arg2[%c0, %c0_0, %c0_1] : memref<1x4x256xf32, #tpu.memory_space<vmem>>, vector<1x4x256xf32>
    %1 = vector.shape_cast %0 : vector<1x4x256xf32> to vector<4x256xf32>
    %c0_2 = arith.constant 0 : index
    %c0_3 = arith.constant 0 : index
    %2 = vector.load %arg3[%c0_2, %c0_3] : memref<4x1xf32, #tpu.memory_space<vmem>>, vector<4x1xf32>
    %3 = vector.broadcast %2 : vector<4x1xf32> to vector<4x256xf32>
    %4 = arith.mulf %1, %3 : vector<4x256xf32>
    %c0_4 = arith.constant 0 : index
    %c0_5 = arith.constant 0 : index
    %5 = vector.load %arg4[%c0_4, %c0_5] : memref<4x1xf32, #tpu.memory_space<vmem>>, vector<4x1xf32>
    %6 = vector.broadcast %5 : vector<4x1xf32> to vector<4x256xf32>
    %7 = arith.addf %4, %6 : vector<4x256xf32>
    %cst = arith.constant 0.000000e+00 : f32
    %8 = vector.broadcast %cst : f32 to vector<4x256xf32>
    %9 = arith.maximumf %7, %8 : vector<4x256xf32>
    %c0_6 = arith.constant 0 : index
    %c0_7 = arith.constant 0 : index
    %10 = vector.load %arg5[%c0_6, %c0_7] : memref<256x64xf32, #tpu.memory_space<vmem>>, vector<256x64xf32>
    %cst_8 = arith.constant dense<0.000000e+00> : vector<4x64xf32>
    %11 = tpu.matmul %9, %10, %cst_8 {dimension_numbers = #tpu.dot_dimension_numbers<[1], [0], [0], [1], [0, 0, 1, 1], [], []>} : vector<4x256xf32>, vector<256x64xf32>, vector<4x64xf32> -> vector<4x64xf32>
    %c0_9 = arith.constant 0 : index
    %c0_10 = arith.constant 0 : index
    %12 = vector.load %arg6[%c0_9, %c0_10] : memref<8x4xf32, #tpu.memory_space<vmem>>, vector<8x4xf32>
    %cst_11 = arith.constant dense<0.000000e+00> : vector<8x64xf32>
    %13 = tpu.matmul %12, %11, %cst_11 {dimension_numbers = #tpu.dot_dimension_numbers<[1], [0], [0], [1], [0, 0, 1, 1], [], []>} : vector<8x4xf32>, vector<4x64xf32>, vector<8x64xf32> -> vector<8x64xf32>
    %c0_12 = arith.constant 0 : index
    %c0_13 = arith.constant 0 : index
    %c0_14 = arith.constant 0 : index
    %14 = vector.load %arg7[%c0_12, %c0_13, %c0_14] : memref<1x8x64xf32, #tpu.memory_space<vmem>>, vector<1x8x64xf32>
    %15 = vector.shape_cast %14 : vector<1x8x64xf32> to vector<8x64xf32>
    %16 = vector.shape_cast %13 : vector<8x64xf32> to vector<1x8x64xf32>
    tpu.vector_store %arg7[%c0_12, %c0_13, %c0_14], %16 {strides = array<i32>} : memref<1x8x64xf32, #tpu.memory_space<vmem>>, vector<1x8x64xf32>,
    return
  }
  func.func @transform_0(%arg0: i32, %arg1: i32) -> (i32, i32, i32) {
    %c0_i32 = arith.constant 0 : i32
    %c0_i32_0 = arith.constant 0 : i32
    return %arg0, %c0_i32, %arg1 : i32, i32, i32
  }
  func.func @transform_1(%arg0: i32, %arg1: i32) -> (i32, i32) {
    %c0_i32 = arith.constant 0 : i32
    %c0_i32_0 = arith.constant 0 : i32
    %c0_i32_1 = arith.constant 0 : i32
    return %c0_i32, %c0_i32_0 : i32, i32
  }
  func.func @transform_2(%arg0: i32, %arg1: i32) -> (i32, i32) {
    %c0_i32 = arith.constant 0 : i32
    %c0_i32_0 = arith.constant 0 : i32
    %c0_i32_1 = arith.constant 0 : i32
    return %c0_i32, %c0_i32_0 : i32, i32
  }
  func.func @transform_3(%arg0: i32, %arg1: i32) -> (i32, i32) {
    %c0_i32 = arith.constant 0 : i32
    %c0_i32_0 = arith.constant 0 : i32
    %c0_i32_1 = arith.constant 0 : i32
    return %c0_i32, %c0_i32_0 : i32, i32
  }
  func.func @transform_4(%arg0: i32, %arg1: i32) -> (i32, i32) {
    %c0_i32 = arith.constant 0 : i32
    %c0_i32_0 = arith.constant 0 : i32
    %c0_i32_1 = arith.constant 0 : i32
    return %c0_i32, %c0_i32_0 : i32, i32
  }
  func.func @transform_5(%arg0: i32, %arg1: i32) -> (i32, i32, i32) {
    %c0_i32 = arith.constant 0 : i32
    %c0_i32_0 = arith.constant 0 : i32
    return %arg0, %c0_i32, %arg1 : i32, i32, i32
  }
}

</mosaic_0001>

<bundles_post_ra>
// kernel: tpu_custom_call.1
= control target key start
LH: loop header
LB: loop body
LE: loop exit
PB: predicated region body
PF: predicated region fallthrough
CT: control target
= control target key end

     0   :  { %10 = vsyncpa [#allocation3], 0  ;;  %s1039_s0 = inlined_call_operand.vmem [shape: f32[2,4,256], index: 0, kind: input, shape index: {}]   ;;  %s1040_s1 = inlined_call_operand.vmem [shape: f32[4,1], index: 1, kind: input, shape index: {}]   ;;  %s1041_s2 = inlined_call_operand.vmem [shape: f32[4,1], index: 2, kind: input, shape index: {}]   ;;  %s1042_s3 = inlined_call_operand.vmem [shape: f32[256,64], index: 3, kind: input, shape index: {}]   ;;  %s1043_s4 = inlined_call_operand.vmem [shape: f32[8,4], index: 4, kind: input, shape index: {}]   ;;  %s1044_s5 = inlined_call_operand.hbm [shape: f32[2,8,64], index: 5, kind: output, shape index: {}]  }
   0x1   :  { %12 = vsyncpa [#allocation3 + $0x1], 0  ;;  %s822_s18 = smov 0   ;;  %s824_s19 = smov 0  }
   0x2   :  { %s826_s20 = smov 0   ;;  %s828_s21 = smov 0  }
   0x3   :  { %s830_s22 = smov 0   ;;  %s832_s23 = smov 0  }
   0x4 LB: > { %s558_s24 = sadd.s32 4294967295, %s785_s23   ;;  %s559_s25 = sadd.s32 4294967294, %s785_s23   ;;  %s785_s23 = sphi %s832_s23, %s18_s23   ;;  %s781_s22 = sphi %s830_s22, %s1051_s22   ;;  %s777_s21 = sphi %s828_s21, %s1050_s21   ;;  %s773_s20 = sphi %s826_s20, %s1049_s20   ;;  %s769_s19 = sphi %s824_s19, %s1048_s19   ;;  %s765_s18 = sphi %s822_s18, %s1047_s18  }
   0x5   : > { %s30_s26 = sadd.s32 1, %s781_s22  ;;  %s151_s27 = sadd.s32 1, %s773_s20 }
   0x6   : > { %p32_p0 = scmp.ge.s32.totalorder %s30_s26, 2  ;;  %p161_p1 = scmp.ne.s32.totalorder %s773_s20, %s769_s19 }
   0x7   : > { %p162_p2 = scmp.eq.s32.totalorder %s558_s24, 1  ;;  %p167_p3 = scmp.ne.s32.totalorder %s769_s19, %s765_s18 }
   0x8   : > { %s1053_s26 = smov (%p32_p0, %s30_s26), 0  ;;  %p168_p5 = scmp.eq.s32.totalorder %s559_s25, 1 }
   0x9   : > { %p862_p4 = por %p162_p2, %p161_p1  ;;  %s146_s29 = ssub.s32 %s781_s22, %s1053_s26 }
   0xa   : > { %p562_p6 = scmp.ge.s32.totalorder %s785_s23, 1  ;;  %p149_p7 = scmp.eq.s32.totalorder %s146_s29, 0 }
   0xb   : > { %p869_p8 = por %p168_p5, %p167_p3  ;;  %p211_p9 = scmp.lt.s32.totalorder %s785_s23, 3 }
   0xc   : > { %s875_s6 = scalar_select %p149_p7, %s773_s20, %s151_s27  }
   0xd   : > { %p212_p10 = pnand %p562_p6, %p211_p9 }
   0xe   : > { %v254_v0 = vld [vmem:[%s1040_s1] sm:$0xf] (!%p212_p10)  ;;  %v787_v2 = vmov (!%p212_p10), 0   ;;  %v300_v4 = vld [vmem:[%s1042_s3 + $0x88] sm:$0xff] (!%p212_p10)  ;;  %v301_v9 = vld [vmem:[%s1042_s3 + $0x90] sm:$0xff] (!%p212_p10)  ;;  %p244_p11 = scmp.lt.s32.totalorder (!%p212_p10), %s777_s21, 1  ;;  %v262_v53 = vlaneseq (!%p212_p10) }
   0xf   : > { %215 = sbr.rel (%p212_p10) target bundleno = 599 (0x257), region = 40  ;;  %v299_v1 = vld [vmem:[%s1042_s3 + $0x80] sm:$0xff] (!%p212_p10)  ;;  %706 = vset.pattern.permute.xlu0 (!%p212_p10), %v787_v2  ;;  %v284_v6 = vld [vmem:[%s1042_s3 + $0x8] sm:$0xff] (!%p212_p10)  ;;  %v302_v10 = vld [vmem:[%s1042_s3 + $0x98] sm:$0xff] (!%p212_p10)  ;;  %v788_v51 = vmov (!%p212_p10), 839922192  }
  0x10   : > { %v268_v3 = vld [vmem:[%s1041_s2] sm:$0xf] (!%p212_p10)  ;;  %257 = vperm.xlu0 (!%p212_p10), %706, %v254_v0   ;;  %v615_v7 = vpack.c.bf16 (!%p212_p10), %v300_v4, %v299_v1  ;;  %v285_v11 = vld [vmem:[%s1042_s3 + $0x10] sm:$0xff] (!%p212_p10)  ;;  %v619_v12 = vpack.c.bf16 (!%p212_p10), %v302_v10, %v301_v9  ;;  %v286_v13 = vld [vmem:[%s1042_s3 + $0x18] sm:$0xff] (!%p212_p10)  ;;  %v260_v52 = vunpack.c.l.s4 (!%p212_p10), %v788_v51  ;;  %v263_v55 = vshrl.u32 (!%p212_p10), %v262_v53, 7  ;;  %s240_s7 = sand.u32 (!%p212_p10), 1, %s769_s19  }
  0x11   : > { %v283_v5 = vld [vmem:[%s1042_s3] sm:$0xff] (!%p212_p10)  ;;  %v304_v15 = vld [vmem:[%s1042_s3 + $0xa8] sm:$0xff] (!%p212_p10)  ;;  %v621_v16 = vpack.c.bf16 (!%p212_p10), %v286_v13, %v285_v11  ;;  %v305_v20 = vld [vmem:[%s1042_s3 + $0xb0] sm:$0xff] (!%p212_p10)  ;;  %v789_v2 = vmov (!%p212_p10), 0.0   ;;  %vm790_vm0 = vmmov (!%p212_p10), 0   ;;  %vm393_vm1 = vcmask (!%p212_p10), 1043456  }
  0x12   : > { %v617_v8 = vpack.c.bf16 (!%p212_p10), %v284_v6, %v283_v5  ;;  %v303_v14 = vld [vmem:[%s1042_s3 + $0xa0] sm:$0xff] (!%p212_p10)  ;;  %616 = vmatprep.subr.bf16.mxu0 (!%p212_p10), %v615_v7  ;;  %v288_v19 = vld [vmem:[%s1042_s3 + $0x28] sm:$0xff] (!%p212_p10)  ;;  %v306_v21 = vld [vmem:[%s1042_s3 + $0xb8] sm:$0xff] (!%p212_p10)  ;;  %v261_v54 = vunpack.c.0.s8 (!%p212_p10), %v260_v52  ;;  %610 = vmatprep.subr.mxu1 (!%p212_p10), %v789_v2  ;;  %vm389_vm2 = vcmask (!%p212_p10), 31744   ;;  %s563_s8 = sshll.u32 (!%p212_p10), %s240_s7, 3  ;;  %s569_s9 = sshll.u32 (!%p212_p10), %s777_s21, 7 }
  0x13   : > { %v623_v17 = vpack.c.bf16 (!%p212_p10), %v304_v15, %v303_v14  ;;  %v287_v18 = vld [vmem:[%s1042_s3 + $0x20] sm:$0xff] (!%p212_p10)  ;;  %v627_v23 = vpack.c.bf16 (!%p212_p10), %v306_v21, %v305_v20  ;;  %v289_v24 = vld [vmem:[%s1042_s3 + $0x30] sm:$0xff] (!%p212_p10)  ;;  %v290_v25 = vld [vmem:[%s1042_s3 + $0x38] sm:$0xff] (!%p212_p10)  ;;  %612 = vmatprep.mubr.msk.f32.mxu1 (!%p212_p10), %vm790_vm0, %v789_v2  ;;  %s242_s10 = scalar_lea.vmem (!%p212_p10), [#allocation2], %s563_s8  ;;  %vm467_vm3 = vcmask (!%p212_p10), 523264   ;;  %s992_s14 = scalar_lea.hbm (!%p212_p10), %s1044_s5, %s569_s9 }
  0x14   : > { %618 = vmatpush3.bf16.msra.mxu0 (!%p212_p10), %v617_v8  ;;  %271 = vperm.xlu0 (!%p212_p10), %706, %v268_v3   ;;  %v625_v22 = vpack.c.bf16 (!%p212_p10), %v288_v19, %v287_v18  ;;  %v307_v26 = vld [vmem:[%s1042_s3 + $0xc0] sm:$0xff] (!%p212_p10)  ;;  %v308_v27 = vld [vmem:[%s1042_s3 + $0xc8] sm:$0xff] (!%p212_p10)  ;;  %v629_v28 = vpack.c.bf16 (!%p212_p10), %v290_v25, %v289_v24  ;;  %v309_v32 = vld [vmem:[%s1042_s3 + $0xd0] sm:$0xff] (!%p212_p10)  ;;  %v264_v56 = vsub.s32 (!%p212_p10), %v261_v54, %v263_v55  ;;  %s484_s11 = sshll.u32 (!%p212_p10), %s242_s10, 4  ;;  %s994_s11 = int_to_ptr.vmem [resolvable:$true] %s484_s11 }
  0x15   : > { %620 = vmatprep.subr.bf16.mxu0 (!%p212_p10), %v619_v12  ;;  %v631_v29 = vpack.c.bf16 (!%p212_p10), %v308_v27, %v307_v26  ;;  %v291_v30 = vld [vmem:[%s1042_s3 + $0x40] sm:$0xff] (!%p212_p10)  ;;  %v292_v31 = vld [vmem:[%s1042_s3 + $0x48] sm:$0xff] (!%p212_p10)  ;;  %v310_v33 = vld [vmem:[%s1042_s3 + $0xd8] sm:$0xff] (!%p212_p10) }
  0x16   : > { %v633_v34 = vpack.c.bf16 %v292_v31, %v291_v30  ;;  %v635_v35 = vpack.c.bf16 %v310_v33, %v309_v32  ;;  %v293_v36 = vld [vmem:[%s1042_s3 + $0x50] sm:$0xff]  ;;  %v294_v37 = vld [vmem:[%s1042_s3 + $0x58] sm:$0xff]  ;;  %v311_v38 = vld [vmem:[%s1042_s3 + $0xe0] sm:$0xff]  ;;  %s245_s15 = scalar_select %p244_p11, %s777_s21, 1 }
  0x17   : > { %v312_v39 = vld [vmem:[%s1042_s3 + $0xe8] sm:$0xff]  ;;  %v637_v40 = vpack.c.bf16 %v294_v37, %v293_v36  ;;  %v295_v42 = vld [vmem:[%s1042_s3 + $0x60] sm:$0xff]  ;;  %v313_v44 = vld [vmem:[%s1042_s3 + $0xf0] sm:$0xff]  ;;  %s791_s21 = smov [#allocation2]  }
  0x18   : > { %622 = vmatpush3.bf16.msra.mxu0 %v621_v16  ;;  %v639_v41 = vpack.c.bf16 %v312_v39, %v311_v38  ;;  %v296_v43 = vld [vmem:[%s1042_s3 + $0x68] sm:$0xff]  ;;  %v314_v45 = vld [vmem:[%s1042_s3 + $0xf8] sm:$0xff]  ;;  %v297_v48 = vld [vmem:[%s1042_s3 + $0x70] sm:$0xff]  ;;  %s572_s16 = sshll.u32 %s245_s15, 3  ;;  %s470_s15 = scalar_lea.sflag [#allocation3], %s240_s7 }
  0x19   : > { %624 = vmatprep.subr.bf16.mxu0 %v623_v17  ;;  %v641_v46 = vpack.c.bf16 %v296_v43, %v295_v42  ;;  %v643_v47 = vpack.c.bf16 %v314_v45, %v313_v44  ;;  %v298_v49 = vld [vmem:[%s1042_s3 + $0x78] sm:$0xff]  ;;  %s251_s25 = scalar_lea.vmem %s1039_s0, %s572_s16  ;;  %v388_v6 = vld [vmem:[%s1043_s4] sm:$0xff]  ;;  %s707_s16 = scalar_lea.vmem %s994_s11, 128 }
  0x1a   : > { %v645_v50 = vpack.c.bf16 %v298_v49, %v297_v48  ;;  %v253_v59 = vld [vmem:[%s251_s25] sm:$0xff]  ;;  %p708_p12 = scmp.ne.s32.totalorder %s994_s11, %s707_s16  ;;  %s711_s17 = sshll.u32 %s791_s21, 4  ;;  %s712_s17 = int_to_ptr.vmem [resolvable:$false] %s711_s17 }
  0x1b   : > { %s713_s24 = scalar_lea.vmem %s712_s17, 256  ;;  %p714_p1 = scmp.lt.s32.totalorder %s994_s11, %s712_s17 }
  0x1c   : > { %626 = vmatpush3.bf16.msra.mxu0 %v625_v22  ;;  %p709_p13 = pnand %p708_p12, %p862_p4  ;;  %p715_p2 = scmp.lt.s32.totalorder %s713_s24, %s707_s16 }
  0x1d   : > { %628 = vmatprep.subr.bf16.mxu0 %v627_v23 }
  0x1e   : > { %p710_p0 = pneg %p709_p13  ;;  %p716_p3 = por %p715_p2, %p714_p1 }
  0x20   : > { %630 = vmatpush3.bf16.msra.mxu0 %v629_v28  ;;  %p717_p5 = pnand %p716_p3, %p710_p0 }
  0x21   : > { %632 = vmatprep.subr.bf16.mxu0 %v631_v29 }
  0x24   : > { %634 = vmatpush3.bf16.msra.mxu0 %v633_v34 }
  0x25   : > { %636 = vmatprep.subr.bf16.mxu0 %v635_v35 }
  0x28   : > { %638 = vmatpush3.bf16.msra.mxu0 %v637_v40 }
  0x29   : > { %640 = vmatprep.subr.bf16.mxu0 %v639_v41 }
  0x2c   : > { %642 = vmatpush3.bf16.msra.mxu0 %v641_v46 }
  0x2d   : > { %644 = vmatprep.subr.bf16.mxu0 %v643_v47 }
  0x30   : > { %646 = vmatpush3.bf16.msra.mxu0 %v645_v50 }
  0x8f   : > { %v258_v57 = vpop.permute.xlu0 %257 }
  0x90   : > { %v265_v58 = vrot.slane %v258_v57, %v264_v56 }
  0x92   : > { %v267_v61 = vmul.f32 %v265_v58, %v253_v59 }
  0x93   : > { %v272_v60 = vpop.permute.xlu0 %271 }
  0x94   : > { %v279_v62 = vrot.slane %v272_v60, %v264_v56 }
  0x96   : > { %v281_v63 = vadd.f32 %v279_v62, %v267_v61 }
  0x98   : > { %v282_v0 = vmax.f32 %v281_v63, 0.0 }
  0x9a   : > { %v316_v1 = vcombine.high %v282_v0, %v282_v0 }
  0x9c   : > { %382 = vmatprep.mubr.f32.mxu0 %v316_v1 }
  0x9d   : > { %383 = vmatmul.mubr.f32.vlgmr.msra.gmra.mrb[0].mxu0 %v282_v0 }
 0x170   : > { %v605_v3 = vpop.f32.mrb[0].mxu0 }
 0x171   : > { %v606_v4 = vpop.f32.mrb[1].mxu0 }
 0x172   : > { %v607_v5 = vadd.f32 %v606_v4, %v605_v3 }
 0x174   : > { %611 = vmatpush3.msk.msra.mxu1 %vm393_vm1, %v607_v5 }
 0x175   : > { %613 = vmatmul.mubr.msk.f32.vlgmr.msra.gmra.mrb[0].mxu1 %vm389_vm2, %v388_v6 }
 0x248   : > { %v463_v7 = vpop.f32.mrb[0].mxu1 }
 0x249   : > { %468 = vst.msk [vmem:[%s242_s10] sm:$0xff] %vm467_vm3, %v463_v7  ;;  %v614_v8 = vpop.f32.mrb[1].mxu1 }
 0x24a   : > { %720 = shalt.err (!%p717_p5)
}
 0x24b   : > { %s721_s25 = scalar_lea.hbm %s992_s14, 128  ;;  %s725_s7 = scalar_lea.hbm %s1044_s5, 256 }
 0x24c   : > { %p722_p6 = scmp.ne.s32.totalorder %s992_s14, %s721_s25  ;;  %p726_p10 = scmp.lt.u32.totalorder %s992_s14, %s1044_s5 }
 0x24d   : > { %p727_p11 = scmp.lt.u32.totalorder %s725_s7, %s721_s25  ;;  %p729_p13 = scmp.lt.u32.totalorder %s721_s25, %s992_s14 }
 0x24e   : > { %p723_p7 = pnand %p722_p6, %p862_p4 }
 0x24f   : > { %p728_p12 = por %p727_p11, %p726_p10 }
 0x250   : > { %p724_p9 = pneg %p723_p7 }
 0x251   : > { %p730_p0 = por %p729_p13, %p728_p12 }
 0x253   : > { %p731_p1 = pnand %p730_p0, %p724_p9 }
 0x255   : > { %734 = shalt.err (!%p731_p1)
}
 0x256   : > { %647 = dma.vmem_to_hbm [thread:$0]  (%p862_p4), %s994_s11, 128, %s992_s14, %s470_s15  }
 0x257 PF: > { %p653_p2 = scmp.ge.s32.totalorder %s785_s23, 2  ;;  %s496_s10 = sand.u32 1, %s765_s18  }
 0x258   : > { %s497_s12 = scalar_lea.sflag [#allocation3], %s496_s10 }
 0x259   : > { %p650_p3 = pnand %p653_p2, %p869_p8 }
 0x25b   : > { %760 = dma.done.wait (!%p650_p3), %s497_s12, 128  }
 0x25c   : > { %762 = vsyncadd (!%p650_p3), %s497_s12, 4294967168  ;;  %s18_s23 = sadd.s32 1, %s785_s23   ;;  %s1047_s18 = smov %s769_s19 }
 0x25d   : > { %p15_p5 = scmp.ge.s32.totalorder %s18_s23, 4   ;;  %s1048_s19 = smov %s773_s20 }
 0x25e   : > { %s1049_s20 = smov %s875_s6  ;;  %s1050_s21 = smov %s781_s22 }
 0x25f   : > { %s1051_s22 = smov %s1053_s26  ;;  %17 = sbr.rel (!%p15_p5) target bundleno = 4 (0x4), region = 75 }
 0x266   :  { %502 = vsyncpa [#allocation3], 1 }
 0x267   :  { %504 = vsyncpa [#allocation3 + $0x1], 1 }

</bundles_post_ra>
